<compile_context>
chip_gen: v7x
topology: tpu7x:2x2x1
jax: 0.10.0
libtpu: 0.0.40
codegen_flags: <defaults>
</compile_context>

<pallas_src>
import functools

import jax
import jax.numpy as jnp
from jax.experimental import pallas as pl
from jax.experimental.pallas import tpu as pltpu

_MIB = 1024 * 1024


# ---------------------------------------------------------------------------
# Sizing helpers
# ---------------------------------------------------------------------------
def _vmem_limit_bytes() -> int:
    """Scoped-VMEM request per generation, leaving headroom for compiler scratch."""
    cap = 64 * _MIB
    try:
        info = pltpu.get_tpu_info()
        cap = int(getattr(info, "vmem_capacity_bytes", cap))
    except Exception:
        pass
    # ~65% of physical: ~41 MiB on v7x (64 MiB/TC), ~83 MiB on v5e/v6e (128 MiB).
    return max(16 * _MIB, min(int(cap * 0.65), 100 * _MIB))


def _largest_lane_tile(total_lanes: int, per_lane_bytes: int, budget_bytes: int) -> int:
    """Largest 128-multiple divisor of total_lanes whose block fits the budget."""
    base = total_lanes // 128
    best = 128
    for d in range(1, base + 1):
        if base % d == 0:
            tile = d * 128
            if tile * per_lane_bytes <= budget_bytes and tile > best:
                best = tile
    return min(best, total_lanes)


def _largest_divisor(n: int, cap: int) -> int:
    best = 1
    for d in range(1, n + 1):
        if n % d == 0 and d <= cap:
            best = d
    return best


# ---------------------------------------------------------------------------
# Kernels
# ---------------------------------------------------------------------------
def _fused_bn_kernel(x_ref, g_ref, b_ref, o_ref, *, eps: float, inv_total: float):
    """Single-pass BN: x resident in VMEM, loaded once, normalized in place."""
    xf = x_ref[...].astype(jnp.float32)                               # (N, C, HW)
    s = jnp.sum(jnp.sum(xf, axis=2, keepdims=True), axis=0)           # (C, 1)
    ss = jnp.sum(jnp.sum(xf * xf, axis=2, keepdims=True), axis=0)     # (C, 1)
    mean = s * inv_total
    # NOTE: E[x^2] - E[x]^2 in f32; adequate for roughly zero-centered inputs.
    var = ss * inv_total - mean * mean
    inv_std = jax.lax.rsqrt(var + eps)
    scale = g_ref[...] * inv_std                                      # (C, 1)
    shift = b_ref[...] - mean * scale
    o_ref[...] = (xf * scale[None, :, :] + shift[None, :, :]).astype(o_ref.dtype)


def _stats_kernel(x_ref, psum_ref, psumsq_ref, s_ref, ss_ref):
    """Pass 1: per-leading-block partial (sum, sumsq) per channel.

    x_ref:      (n_blk, C, hw_tile) input block
    psum_ref:   (1, C, 1) output partial sum for this leading block
    psumsq_ref: (1, C, 1) output partial sum of squares
    s_ref, ss_ref: (C, 1) f32 narrow scratch accumulators
    """
    t = pl.program_id(1)

    @pl.when(t == 0)
    def _init():
        s_ref[...] = jnp.zeros_like(s_ref)
        ss_ref[...] = jnp.zeros_like(ss_ref)

    xb = x_ref[...].astype(jnp.float32)                               # (n_blk, C, hw_tile)
    # Per-tile lane reduction (XLU slot, free while HBM-bound) into narrow
    # accumulators: avoids wide (C, hw_tile) accumulator stores entirely.
    s_ref[...] += jnp.sum(jnp.sum(xb, axis=2, keepdims=True), axis=0)
    ss_ref[...] += jnp.sum(jnp.sum(xb * xb, axis=2, keepdims=True), axis=0)

    @pl.when(t == pl.num_programs(1) - 1)
    def _emit():
        psum_ref[0] = s_ref[...]
        psumsq_ref[0] = ss_ref[...]


def _normalize_kernel(x_ref, scale_ref, shift_ref, o_ref):
    """Pass 2 hot loop: y = x * scale + shift, lane-dense stores."""
    scale = scale_ref[...][None, :, :]                                # (1, C, 1)
    shift = shift_ref[...][None, :, :]
    o_ref[...] = (x_ref[...].astype(jnp.float32) * scale + shift).astype(o_ref.dtype)


# ---------------------------------------------------------------------------
# Wrapper
# ---------------------------------------------------------------------------
def domain_specific_batchnorm(x, domain_label, gamma, beta, eps=1e-5, *,
                              force_two_pass=False):
    """Forward of _DomainSpecificBatchNorm (training mode).

    x:            (N, C, H, W) float32 (NCHW, like PyTorch)
    domain_label: (N,) int32 -- domain_label[0] selects the BN
    gamma, beta:  (num_classes, C) float32
    returns (y, domain_label) with y shaped (N, C, H, W)
    """
    N, C, H, W = x.shape
    HW = H * W
    total = N * HW

    x3 = x.reshape(N, C, HW)                       # free reshape (merge trailing dims)
    dl = domain_label.astype(jnp.int32)

    # Domain selection: a C-element dynamic row gather, done in plain JAX.
    d = dl[0]
    g_row = gamma.astype(jnp.float32)[d].reshape(C, 1)
    b_row = beta.astype(jnp.float32)[d].reshape(C, 1)

    vmem_limit = _vmem_limit_bytes()

    # ---- Fused single-pass fast path: whole activation resident in VMEM ----
    x_f32_bytes = 4 * N * C * HW
    if not force_two_pass and 6 * x_f32_bytes <= vmem_limit:
        y3 = pl.pallas_call(
            functools.partial(_fused_bn_kernel, eps=float(eps),
                              inv_total=1.0 / float(total)),
            out_shape=jax.ShapeDtypeStruct((N, C, HW), x.dtype),
            compiler_params=pltpu.CompilerParams(vmem_limit_bytes=vmem_limit),
        )(x3, g_row, b_row)
        return y3.reshape(N, C, H, W), domain_label

    # ---- Two-pass path ----
    # Lane-pad HW to a multiple of 128: padded zeros contribute nothing to the
    # sums and we divide by the true element count, so stats stay exact.
    HWp = ((HW + 127) // 128) * 128
    x3p = x3 if HWp == HW else jnp.pad(x3, ((0, 0), (0, 0), (0, HWp - HW)))

    # Block sizing: pass 2 keeps 4 double-buffered (n_blk, C, hw_tile) f32-sized
    # blocks live; budget each block at ~1/6 of the scoped limit.
    block_budget = max(_MIB // 2, vmem_limit // 6)
    hw_tile = _largest_lane_tile(HWp, 4 * C, block_budget)
    n_blk = 1
    if hw_tile == HWp:
        n_blk = _largest_divisor(N, max(1, block_budget // (4 * C * HWp)))
    n_hw = HWp // hw_tile
    n_outer = N // n_blk

    # Pass 1: per-leading-block partial sums; leading axis "parallel" so a
    # multi-TensorCore chip (v7x) can split the heavy HBM read.
    psum, psumsq = pl.pallas_call(
        _stats_kernel,
        out_shape=(jax.ShapeDtypeStruct((n_outer, C, 1), jnp.float32),
                   jax.ShapeDtypeStruct((n_outer, C, 1), jnp.float32)),
        grid=(n_outer, n_hw),
        in_specs=[pl.BlockSpec((n_blk, C, hw_tile), lambda i, t: (i, 0, t))],
        out_specs=[pl.BlockSpec((1, C, 1), lambda i, t: (i, 0, 0)),
                   pl.BlockSpec((1, C, 1), lambda i, t: (i, 0, 0))],
        scratch_shapes=[pltpu.VMEM((C, 1), jnp.float32),
                        pltpu.VMEM((C, 1), jnp.float32)],
        compiler_params=pltpu.CompilerParams(
            dimension_semantics=("parallel", "arbitrary"),
            vmem_limit_bytes=vmem_limit),
    )(x3p)

    # Tiny finalize (C elements) in plain JAX.
    sums = jnp.sum(psum[:, :, 0], axis=0)                    # (C,)
    sqs = jnp.sum(psumsq[:, :, 0], axis=0)
    mean = sums / float(total)
    var = sqs / float(total) - mean * mean                   # biased batch variance
    inv_std = jax.lax.rsqrt(var + float(eps))
    scale = (g_row[:, 0] * inv_std).reshape(C, 1)
    shift = (b_row[:, 0] - mean * g_row[:, 0] * inv_std).reshape(C, 1)

    # Pass 2: y = x * scale + shift (embarrassingly parallel, lane-dense).
    y3 = pl.pallas_call(
        _normalize_kernel,
        out_shape=jax.ShapeDtypeStruct((N, C, HWp), x.dtype),
        grid=(n_outer, n_hw),
        in_specs=[pl.BlockSpec((n_blk, C, hw_tile), lambda i, t: (i, 0, t)),
                  pl.BlockSpec((C, 1), lambda i, t: (0, 0)),
                  pl.BlockSpec((C, 1), lambda i, t: (0, 0))],
        out_specs=pl.BlockSpec((n_blk, C, hw_tile), lambda i, t: (i, 0, t)),
        compiler_params=pltpu.CompilerParams(
            dimension_semantics=("parallel", "parallel"),
            vmem_limit_bytes=vmem_limit),
    )(x3p, scale, shift)

    if HWp != HW:
        y3 = y3[:, :, :HW]
    return y3.reshape(N, C, H, W), domain_label


# ---------------------------------------------------------------------------
# Reference + test
# ---------------------------------------------------------------------------
def _reference(x, domain_label, gamma, beta, eps=1e-5):
    """Pure-JAX reference matching PyTorch BatchNorm2d training forward."""
    d = domain_label[0]
    g = gamma[d][None, :, None, None]
    b = beta[d][None, :, None, None]
    mean = jnp.mean(x, axis=(0, 2, 3), keepdims=True)
    var = jnp.mean((x - mean) ** 2, axis=(0, 2, 3), keepdims=True)
    return (x - mean) / jnp.sqrt(var + eps) * g + b


if __name__ == "__main__":
    key = jax.random.PRNGKey(0)
    kx, kg, kb, kx2 = jax.random.split(key, 4)

    N, C, H, W = 2, 4, 16, 16
    num_classes = 3

    x = jax.random.normal(kx, (N, C, H, W), dtype=jnp.float32)
    domain_label = jnp.array([1, 1], dtype=jnp.int32)

    # nn.BatchNorm2d init is weight=1, bias=0; perturb deterministically so the
    # affine path and domain selection are actually exercised.
    gamma = 1.0 + 0.1 * jax.random.normal(kg, (num_classes, C), dtype=jnp.float32)
    beta = 0.1 * jax.random.normal(kb, (num_classes, C), dtype=jnp.float32)

    y_ref = _reference(x, domain_label, gamma, beta)

    # 1) Fused single-pass fast path (small activation -> resident in VMEM).
    y_fused, dl_out = domain_specific_batchnorm(x, domain_label, gamma, beta)
    y_fused = jax.block_until_ready(y_fused)
    assert y_fused.shape == x.shape and y_fused.dtype == x.dtype
    assert jnp.allclose(y_fused, y_ref, atol=2e-5, rtol=1e-5), "fused mismatch"
    assert jnp.array_equal(dl_out, domain_label)

    # 2) Tiled two-pass path (the path large activations take).
    y_2p, _ = domain_specific_batchnorm(x, domain_label, gamma, beta,
                                        force_two_pass=True)
    y_2p = jax.block_until_ready(y_2p)
    assert jnp.allclose(y_2p, y_ref, atol=2e-5, rtol=1e-5), "two-pass mismatch"

    # 3) Two-pass path with a non-128-multiple spatial size (exercises padding).
    x2 = jax.random.normal(kx2, (2, 4, 10, 10), dtype=jnp.float32)
    y2, _ = domain_specific_batchnorm(x2, domain_label, gamma, beta,
                                      force_two_pass=True)
    y2 = jax.block_until_ready(y2)
    assert jnp.allclose(y2, _reference(x2, domain_label, gamma, beta),
                        atol=2e-5, rtol=1e-5), "padded two-pass mismatch"

    print("KERNEL_OK")
</pallas_src>

<mosaic_0001>
module attributes {stable_mosaic.version = 11 : i64} {
  func.func @_fused_bn_kernel(%arg0: memref<2x4x256xf32, #tpu.memory_space<vmem>>, %arg1: memref<4x1xf32, #tpu.memory_space<vmem>>, %arg2: memref<4x1xf32, #tpu.memory_space<vmem>>, %arg3: memref<2x4x256xf32, #tpu.memory_space<vmem>>) attributes {dimension_semantics = [], scalar_prefetch = 0 : i64, scratch_operands = 0 : i64, tpu.core_type = #tpu.core_type<tc>} {
    %c0 = arith.constant 0 : index
    %c0_0 = arith.constant 0 : index
    %c0_1 = arith.constant 0 : index
    %0 = vector.load %arg0[%c0, %c0_0, %c0_1] : memref<2x4x256xf32, #tpu.memory_space<vmem>>, vector<2x4x256xf32>
    %cst = arith.constant dense<0.000000e+00> : vector<2x4xf32>
    %1 = vector.multi_reduction <add>, %0, %cst [2] : vector<2x4x256xf32> to vector<2x4xf32>
    %2 = vector.shape_cast %1 : vector<2x4xf32> to vector<2x4x1xf32>
    %cst_2 = arith.constant dense<0.000000e+00> : vector<4x1xf32>
    %3 = vector.multi_reduction <add>, %2, %cst_2 [0] : vector<2x4x1xf32> to vector<4x1xf32>
    %4 = arith.mulf %0, %0 : vector<2x4x256xf32>
    %cst_3 = arith.constant dense<0.000000e+00> : vector<2x4xf32>
    %5 = vector.multi_reduction <add>, %4, %cst_3 [2] : vector<2x4x256xf32> to vector<2x4xf32>
    %6 = vector.shape_cast %5 : vector<2x4xf32> to vector<2x4x1xf32>
    %cst_4 = arith.constant dense<0.000000e+00> : vector<4x1xf32>
    %7 = vector.multi_reduction <add>, %6, %cst_4 [0] : vector<2x4x1xf32> to vector<4x1xf32>
    %cst_5 = arith.constant 0.001953125 : f32
    %8 = vector.broadcast %cst_5 : f32 to vector<4x1xf32>
    %9 = arith.mulf %3, %8 : vector<4x1xf32>
    %cst_6 = arith.constant 0.001953125 : f32
    %10 = vector.broadcast %cst_6 : f32 to vector<4x1xf32>
    %11 = arith.mulf %7, %10 : vector<4x1xf32>
    %12 = arith.mulf %9, %9 : vector<4x1xf32>
    %13 = arith.subf %11, %12 : vector<4x1xf32>
    %cst_7 = arith.constant 9.99999974E-6 : f32
    %14 = vector.broadcast %cst_7 : f32 to vector<4x1xf32>
    %15 = arith.addf %13, %14 : vector<4x1xf32>
    %16 = math.rsqrt %15 : vector<4x1xf32>
    %c0_8 = arith.constant 0 : index
    %c0_9 = arith.constant 0 : index
    %17 = vector.load %arg1[%c0_8, %c0_9] : memref<4x1xf32, #tpu.memory_space<vmem>>, vector<4x1xf32>
    %18 = arith.mulf %17, %16 : vector<4x1xf32>
    %c0_10 = arith.constant 0 : index
    %c0_11 = arith.constant 0 : index
    %19 = vector.load %arg2[%c0_10, %c0_11] : memref<4x1xf32, #tpu.memory_space<vmem>>, vector<4x1xf32>
    %20 = arith.mulf %9, %18 : vector<4x1xf32>
    %21 = arith.subf %19, %20 : vector<4x1xf32>
    %22 = vector.shape_cast %18 : vector<4x1xf32> to vector<1x4x1xf32>
    %23 = vector.broadcast %22 : vector<1x4x1xf32> to vector<2x4x256xf32>
    %24 = arith.mulf %0, %23 : vector<2x4x256xf32>
    %25 = vector.shape_cast %21 : vector<4x1xf32> to vector<1x4x1xf32>
    %26 = vector.broadcast %25 : vector<1x4x1xf32> to vector<2x4x256xf32>
    %27 = arith.addf %24, %26 : vector<2x4x256xf32>
    %c0_12 = arith.constant 0 : index
    %c0_13 = arith.constant 0 : index
    %c0_14 = arith.constant 0 : index
    %28 = vector.load %arg3[%c0_12, %c0_13, %c0_14] : memref<2x4x256xf32, #tpu.memory_space<vmem>>, vector<2x4x256xf32>
    tpu.vector_store %arg3[%c0_12, %c0_13, %c0_14], %27 {strides = array<i32>} : memref<2x4x256xf32, #tpu.memory_space<vmem>>, vector<2x4x256xf32>,
    return
  }
}

</mosaic_0001>

<bundles_post_ra>
// kernel: tpu_custom_call.1
= control target key start
LH: loop header
LB: loop body
LE: loop exit
PB: predicated region body
PF: predicated region fallthrough
CT: control target
= control target key end

     0   :  { %8 = vsyncpa [#allocation3], 0  ;;  %s264_s0 = inlined_call_operand.hbm [shape: f32[2,4,256], index: 0, kind: input, shape index: {}]   ;;  %s265_s1 = inlined_call_operand.vmem [shape: f32[4,1], index: 1, kind: input, shape index: {}]   ;;  %s266_s2 = inlined_call_operand.vmem [shape: f32[4,1], index: 2, kind: input, shape index: {}]   ;;  %s267_s3 = inlined_call_operand.hbm [shape: f32[2,4,256], index: 3, kind: output, shape index: {}]  }
   0x1   :  { %9 = vsyncpa [#allocation4], 0  ;;  %s190_s12 = smov [#allocation2]   ;;  %s142_s16 = scalar_lea.hbm %s264_s0, 256 }
   0x2   :  { %s15_s13 = sshll.u32 %s190_s12, 4  ;;  %p143_p0 = scmp.ne.s32.totalorder %s264_s0, %s142_s16  ;;  %s16_s13 = int_to_ptr.vmem [resolvable:$true] %s15_s13 }
   0x3   :  { %p146_p1 = scmp.lt.u32.totalorder %s142_s16, %s264_s0 }
   0x5   :  { %p148_p2 = pnand %p146_p1, %p143_p0 }
   0x7   :  { %151 = shalt.err (!%p148_p2)
}
   0x8   :  { %s152_s21 = scalar_lea.vmem %s16_s13, 256  ;;  %p157_p4 = scmp.lt.s32.totalorder %s16_s13, %s16_s13 }
   0x9   :  { %p153_p3 = scmp.ne.s32.totalorder %s16_s13, %s152_s21  ;;  %p158_p5 = scmp.lt.s32.totalorder %s152_s21, %s152_s21 }
   0xb   :  { %p159_p6 = por %p158_p5, %p157_p4 }
   0xd   :  { %p160_p7 = pnand %p159_p6, %p153_p3 }
   0xf   :  { %163 = shalt.err (!%p160_p7)
}
  0x10   :  { %s191_s22 = smov 128   ;;  %s192_s23 = smov 8  }
  0x11   :  { %21 = dma.hbm_to_vmem [thread:$0]  %s264_s0, 256, %s16_s13, [#allocation3], %s191_s22, %s191_s22, %s192_s23  }
  0x12   :  { %186 = dma.done.wait [#allocation3], 256  }
  0x13   :  { %187 = vsyncadd [#allocation3], 4294967040  ;;  %vm37_vm0 = vcmask 1043456   ;;  %v29_v0 = vld [vmem:[#allocation2] sm:$0xff]  ;;  %v30_v1 = vld [vmem:[#allocation2 + $0x8] sm:$0xff]  ;;  %v193_v20 = vmov 0   ;;  %v90_v44 = vlaneseq }
  0x14   :  { %v33_v2 = vcombine.high %v29_v0, %v29_v0  ;;  %v38_v3 = vsel %vm37_vm0, %v29_v0, 0.0  ;;  %v51_v4 = vmul.f32 %v29_v0, %v29_v0  ;;  %v34_v5 = vcombine.high %v30_v1, %v30_v1  ;;  %136 = vset.pattern.permute.xlu0 %v193_v20  ;;  %137 = vset.pattern.permute.xlu1 %v193_v20  ;;  %v78_v36 = vld [vmem:[%s265_s1] sm:$0xf]  ;;  %s195_s1 = smov [#allocation5]  }
  0x15   :  { %v43_v6 = vsel %vm37_vm0, %v30_v1, 0.0  ;;  %v52_v7 = vmul.f32 %v30_v1, %v30_v1  ;;  %v80_v39 = vld [vmem:[%s266_s2] sm:$0xf]  ;;  %v194_v42 = vmov 839922192   ;;  %v91_v46 = vshrl.u32 %v90_v44, 7 }
  0x16   :  { %v39_v8 = vsel %vm37_vm0, %v33_v2, 0.0  ;;  %v55_v9 = vcombine.high %v51_v4, %v51_v4  ;;  %v59_v10 = vsel %vm37_vm0, %v51_v4, 0.0  ;;  %v44_v11 = vsel %vm37_vm0, %v34_v5, 0.0  ;;  %s118_s29 = sshll.u32 %s195_s1, 4  ;;  %s119_s29 = int_to_ptr.vmem [resolvable:$true] %s118_s29 }
  0x17   :  { %v40_v12 = vadd.f32 %v39_v8, %v38_v3  ;;  %v56_v13 = vcombine.high %v52_v7, %v52_v7  ;;  %v64_v15 = vsel %vm37_vm0, %v52_v7, 0.0  ;;  %v45_v17 = vadd.f32 %v44_v11, %v43_v6  ;;  %s164_s2 = scalar_lea.vmem %s119_s29, 256  ;;  %p169_p9 = scmp.lt.s32.totalorder %s119_s29, %s119_s29 }
  0x18   :  { %v60_v14 = vsel %vm37_vm0, %v55_v9, 0.0  ;;  %v88_v43 = vunpack.c.l.s4 %v194_v42  ;;  %p165_p8 = scmp.ne.s32.totalorder %s119_s29, %s164_s2  ;;  %p170_p10 = scmp.lt.s32.totalorder %s164_s2, %s164_s2 }
  0x19   :  { %41 = vadd.xlane.f32.xlu0 %v40_v12  ;;  %v61_v16 = vadd.f32 %v60_v14, %v59_v10  ;;  %v65_v18 = vsel %vm37_vm0, %v56_v13, 0.0 }
  0x1a   :  { %v66_v19 = vadd.f32 %v65_v18, %v64_v15  ;;  %v89_v45 = vunpack.c.0.s8 %v88_v43  ;;  %p171_p11 = por %p170_p10, %p169_p9 }
  0x1b   :  { %62 = vadd.xlane.f32.xlu1 %v61_v16 }
  0x1c   :  { %v92_v47 = vsub.s32 %v89_v45, %v91_v46  ;;  %p172_p12 = pnand %p171_p11, %p165_p8 }
  0x1d   :  { %46 = vadd.xlane.f32.xlu0 %v45_v17 }
  0x1f   :  { %67 = vadd.xlane.f32.xlu1 %v66_v19 }
  0xa6   :  { %v42_v21 = vpop.xlane.xlu0 %41 }
  0xa7   :  { %v48_v24 = vsel %vm37_vm0, %v42_v21, 0.0 }
  0xa8   :  { %v63_v22 = vpop.xlane.xlu1 %62 }
  0xa9   :  { %v69_v28 = vsel %vm37_vm0, %v63_v22, 0.0 }
  0xaa   :  { %v47_v23 = vpop.xlane.xlu0 %46 }
  0xab   :  { %v49_v25 = vsel %vm37_vm0, %v47_v23, 0.0 }
  0xac   :  { %v50_v26 = vadd.f32 %v49_v25, %v48_v24  ;;  %v68_v27 = vpop.xlane.xlu1 %67 }
  0xad   :  { %v70_v29 = vsel %vm37_vm0, %v68_v27, 0.0 }
  0xae   :  { %v72_v30 = vmul.f32 0.001953125, %v50_v26  ;;  %v71_v31 = vadd.f32 %v70_v29, %v69_v28 }
  0xb0   :  { %v74_v32 = vmul.f32 %v72_v30, %v72_v30  ;;  %v73_v33 = vmul.f32 0.001953125, %v71_v31 }
  0xb2   :  { %v75_v34 = vsub.f32 %v73_v33, %v74_v32 }
  0xb4   :  { %v76_v35 = vadd.f32 1e-05, %v75_v34 }
  0xb6   :  { %140 = vrsqrt.f32 %v76_v35 }
  0xc0   :  { %v141_v37 = vpop.eup %140 }
  0xc1   :  { %v79_v38 = vmul.f32 %v141_v37, %v78_v36 }
  0xc3   :  { %85 = vperm.xlu0 %136, %v79_v38   ;;  %v81_v40 = vmul.f32 %v79_v38, %v72_v30 }
  0xc5   :  { %v82_v41 = vsub.f32 %v80_v39, %v81_v40 }
  0xc7   :  { %99 = vperm.xlu1 %137, %v82_v41  }
 0x142   :  { %v86_v48 = vpop.permute.xlu0 %85 }
 0x143   :  { %v93_v49 = vrot.slane %v86_v48, %v92_v47 }
 0x145   :  { %v95_v51 = vmul.f32 %v93_v49, %v29_v0  ;;  %v96_v52 = vmul.f32 %v93_v49, %v30_v1 }
 0x146   :  { %v100_v50 = vpop.permute.xlu1 %99 }
 0x147   :  { %v107_v53 = vrot.slane %v100_v50, %v92_v47 }
 0x149   :  { %v109_v54 = vadd.f32 %v107_v53, %v95_v51  ;;  %v110_v55 = vadd.f32 %v107_v53, %v96_v52 }
 0x14b   :  { %111 = vst [vmem:[#allocation5] sm:$0xff] %v109_v54  ;;  %112 = vst [vmem:[#allocation5 + $0x8] sm:$0xff] %v110_v55 }
 0x14c   :  { %175 = shalt.err (!%p172_p12)
}
 0x14d   :  { %s176_s5 = scalar_lea.hbm %s267_s3, 256 }
 0x14e   :  { %p177_p13 = scmp.ne.s32.totalorder %s267_s3, %s176_s5  ;;  %p180_p0 = scmp.lt.u32.totalorder %s176_s5, %s267_s3 }
 0x150   :  { %p182_p1 = pnand %p180_p0, %p177_p13 }
 0x152   :  { %185 = shalt.err (!%p182_p1)
}
 0x153   :  { %124 = dma.vmem_to_hbm [thread:$0]  %s119_s29, 256, %s267_s3, [#allocation4], %s191_s22, %s191_s22, %s192_s23  }
 0x154   :  { %188 = dma.done.wait [#allocation4], 256  }
 0x155   :  { %189 = vsyncadd [#allocation4], 4294967040 }
 0x156   :  { %128 = vsyncpa [#allocation3], 1 }
 0x157   :  { %129 = vsyncpa [#allocation4], 1 }

</bundles_post_ra>
